<compile_context>
chip_gen: v5e
topology: v5e:2x2
jax: 0.10.0
libtpu: 0.0.40
codegen_flags: <defaults>
</compile_context>

<pallas_src>
import math
import numpy as np
import jax
import jax.numpy as jnp
from jax.experimental import pallas as pl
from jax.experimental.pallas import tpu as pltpu

LOG_SQRT_2PI = math.log(math.sqrt(2.0 * math.pi))
SMALL_STD = 1e-13


def _inv_softplus64(std):
    # torch: log(exp(std) - 1), in float64 (safe for std = 1e-13)
    return np.log(np.expm1(np.asarray(std, np.float64)))


def _softplus64(rho):
    return np.log1p(np.exp(np.asarray(rho, np.float64)))


def _bayes_fused_kernel(eps_ref, mu_ref, sigma_ref, log_sigma_ref,
                        pmu_ref, log_psigma_ref, inv2ps2_ref, w_ref,
                        samples_ref, logq_ref, logp_ref):
    """All 5 Gaussian parameter groups packed along the lane axis of one tile.

    eps_ref, w_ref                  : (Bp, Pp) f32 VMEM
    mu/sigma/log_sigma rows         : (1, Pp)  f32 VMEM (broadcast over sample rows)
    pmu/log_psigma/inv2ps2 rows     : (1, Pp)  f32 VMEM
    samples_ref                     : (Bp, Pp) f32 VMEM output
    logq_ref, logp_ref              : (1, 1)   f32 SMEM scalar outputs
    """
    eps = eps_ref[...]
    w = w_ref[...]

    # reparameterized sample: x = mu + softplus(rho) * eps  (softplus precomputed)
    x = mu_ref[...] + sigma_ref[...] * eps
    samples_ref[...] = x

    # posterior:  -log(sqrt(2pi)) - log(sigma) - (x-mu)^2/(2 sigma^2)
    #           = -log(sqrt(2pi)) - log(sigma) - eps^2/2          (exact identity)
    logq = (-LOG_SQRT_2PI) - log_sigma_ref[...] - 0.5 * eps * eps
    # prior:      -log(sqrt(2pi)) - log(psigma) - (x - pmu)^2 * (0.5/psigma^2)
    d = x - pmu_ref[...]
    logp = (-LOG_SQRT_2PI) - log_psigma_ref[...] - d * d * inv2ps2_ref[...]

    # w already carries the per-group 1/(B_g * P_g), and is 0 on padding, so these
    # weighted sums equal the sum over groups of the per-group masked means.
    logq_ref[0, 0] = jnp.sum(logq * w)
    logp_ref[0, 0] = jnp.sum(logp * w)


class BayesClothPallas:
    """Bayesian material-parameter part of BayesCloth, deterministic init."""

    def __init__(self, num_faces=8, num_bending_edges=12):
        # In the reference these come from reading ./mesh_in/circle3.obj.
        self.num_faces = num_faces
        self.num_bending_edges = num_bending_edges

        six = lambda v: np.full((6,), v, np.float64)
        c12_mean = np.array([0.1, 1.0, 1.0, 1.0, 1.0, 1.0], np.float64)

        bending_mean = np.array(
            [[1.17933348e-05, 2.01009217e-05, 4.01091488e-05, 5.00398193e-05, 5.00369146e-05],
             [1.34345211e-05, 2.01427701e-05, 3.02246364e-05, 4.00903988e-05, 4.00540734e-05],
             [1.15802900e-05, 2.00785103e-05, 4.01148611e-05, 5.00430378e-05, 5.00222191e-05]],
            np.float64).reshape(1, 1, 3, 5)
        bending_std = np.array(
            [[1.25587313e-05, 1.05890424e-06, 1.13075501e-06, 4.51547868e-07, 9.23055293e-07],
             [2.00176490e-05, 1.29456192e-06, 1.16835632e-06, 6.82040884e-07, 8.71083168e-07],
             [1.20509433e-05, 1.49065257e-06, 1.11217522e-06, 4.09651556e-07, 6.89696705e-07]],
            np.float64).reshape(1, 1, 3, 5)
        bending_prior_mean = np.array(
            [[3.17933348e-05, 5.01009217e-05, 5.01091488e-05, 5.00398193e-05, 5.00369146e-05],
             [2.34345211e-05, 4.01427701e-05, 4.02246364e-05, 4.00903988e-05, 4.00540734e-05],
             [3.15802900e-05, 5.00785103e-05, 5.01148611e-05, 5.00430378e-05, 5.00222191e-05]],
            np.float64).reshape(1, 1, 3, 5)
        bending_prior_std = np.full((1, 1, 3, 5), 1e-4, np.float64)

        # (name, mu, rho, prior_mu, prior_rho, batch)
        groups = [
            ("c11", six(200.0), _inv_softplus64(six(SMALL_STD)),
             six(200.0), _inv_softplus64(six(0.01)), num_faces),
            ("c12", c12_mean, _inv_softplus64(six(SMALL_STD)),
             c12_mean.copy(),
             _inv_softplus64(np.array([0.001, 0.01, 0.01, 0.01, 0.01, 0.01])), num_faces),
            ("c22", six(200.0), _inv_softplus64(six(SMALL_STD)),
             six(200.0), _inv_softplus64(six(0.01)), num_faces),
            ("c33", six(5.0), _inv_softplus64(six(SMALL_STD)),
             six(5.0), _inv_softplus64(six(0.01)), num_faces),
            ("bending", bending_mean, _inv_softplus64(bending_std),
             bending_prior_mean, _inv_softplus64(bending_prior_std), num_bending_edges),
        ]

        # Lane layout: concatenate the flattened groups along the lane axis.
        self.layout = {}
        off = 0
        for name, mu, rho, pmu, prho, B in groups:
            P = int(np.prod(mu.shape))
            self.layout[name] = (off, P, B, tuple(mu.shape))
            off += P
        P_total = off
        self.Pp = ((P_total + 127) // 128) * 128          # pad lanes to 128
        self.Bp = ((max(g[-1] for g in groups) + 7) // 8) * 8  # pad sublanes to 8

        # All parameter-derived constants, computed once in float64 on the host.
        mu_row = np.zeros((1, self.Pp), np.float64)
        sigma_row = np.zeros_like(mu_row)
        log_sigma_row = np.zeros_like(mu_row)
        pmu_row = np.zeros_like(mu_row)
        log_psigma_row = np.zeros_like(mu_row)
        inv2ps2_row = np.zeros_like(mu_row)
        weight = np.zeros((self.Bp, self.Pp), np.float64)
        self._f64 = {}

        for name, mu, rho, pmu, prho, B in groups:
            goff, P, _, _ = self.layout[name]
            sigma = _softplus64(rho)
            psigma = _softplus64(prho)
            mu_row[0, goff:goff + P] = mu.reshape(P)
            sigma_row[0, goff:goff + P] = sigma.reshape(P)
            log_sigma_row[0, goff:goff + P] = np.log(sigma).reshape(P)
            pmu_row[0, goff:goff + P] = pmu.reshape(P)
            log_psigma_row[0, goff:goff + P] = np.log(psigma).reshape(P)
            inv2ps2_row[0, goff:goff + P] = (0.5 / psigma ** 2).reshape(P)
            weight[:B, goff:goff + P] = 1.0 / (B * P)      # per-group mean weight
            self._f64[name] = dict(mu=mu.reshape(P), sigma=sigma.reshape(P),
                                   pmu=pmu.reshape(P), psigma=psigma.reshape(P))

        as_f32 = lambda a: jnp.asarray(a.astype(np.float32))
        self._mu = as_f32(mu_row)
        self._sigma = as_f32(sigma_row)
        self._log_sigma = as_f32(log_sigma_row)
        self._pmu = as_f32(pmu_row)
        self._log_psigma = as_f32(log_psigma_row)
        self._inv2ps2 = as_f32(inv2ps2_row)
        self._w = as_f32(weight)

        vmem = pltpu.MemorySpace.VMEM
        smem = pltpu.MemorySpace.SMEM
        # One launch, one (Bp, Pp) tile, no grid / pipelining needed.
        self._kernel = pl.pallas_call(
            _bayes_fused_kernel,
            out_shape=(jax.ShapeDtypeStruct((self.Bp, self.Pp), jnp.float32),
                       jax.ShapeDtypeStruct((1, 1), jnp.float32),
                       jax.ShapeDtypeStruct((1, 1), jnp.float32)),
            in_specs=[pl.BlockSpec(memory_space=vmem)] * 8,
            out_specs=(pl.BlockSpec(memory_space=vmem),
                       pl.BlockSpec(memory_space=smem),
                       pl.BlockSpec(memory_space=smem)),
        )
        self._reset_jit = jax.jit(self._reset_impl)

        self.log_variational_posterior = jnp.float32(0.0)
        self.log_prior = jnp.float32(0.0)

    def _reset_impl(self, key):
        # One normal draw covering all groups in the padded layout (padding lanes
        # have mu = sigma = weight = 0, so they contribute nothing).
        eps = jax.random.normal(key, (self.Bp, self.Pp), dtype=jnp.float32)
        samples_p, logq, logp = self._kernel(
            eps, self._mu, self._sigma, self._log_sigma,
            self._pmu, self._log_psigma, self._inv2ps2, self._w)
        samples = {}
        for name, (goff, P, B, shape) in self.layout.items():
            samples[name] = samples_p[:B, goff:goff + P].reshape((B,) + shape)
        return samples, logq[0, 0], logp[0, 0]

    def reset(self, key):
        """Mirrors BayesCloth.reset(): sample the 5 Gaussian groups and accumulate
        the variational-posterior / prior log-probabilities (one fused Pallas call)."""
        samples, logq, logp = self._reset_jit(key)
        self.log_variational_posterior = logq
        self.log_prior = logp
        return samples, logq, logp

    def forward(self, steps, key):
        # TODO(synk): Simulation.advance_step_cuda (arcsim cloth physics) and the
        # kaolin prepare_vertices / dibr_rasterization render have no Pallas
        # equivalent; only the Bayesian sampling / log-prob hot path is kernelized.
        return self.reset(key)


if __name__ == "__main__":
    key = jax.random.PRNGKey(0)
    model = BayesClothPallas(num_faces=8, num_bending_edges=12)
    samples, log_q, log_p = model.reset(key)
    jax.block_until_ready((samples, log_q, log_p))

    assert samples["c11"].shape == (8, 6)
    assert samples["c12"].shape == (8, 6)
    assert samples["c22"].shape == (8, 6)
    assert samples["c33"].shape == (8, 6)
    assert samples["bending"].shape == (12, 1, 1, 3, 5)
    assert np.isfinite(float(log_q)) and np.isfinite(float(log_p))

    # float64 numpy reference of the same math (same eps draw as inside reset).
    eps_np = np.asarray(jax.random.normal(key, (model.Bp, model.Pp),
                                          dtype=jnp.float32), np.float64)
    ref_q = 0.0
    ref_p = 0.0
    for name, (goff, P, B, shape) in model.layout.items():
        e = eps_np[:B, goff:goff + P]
        c = model._f64[name]
        mu, sigma = c["mu"][None, :], c["sigma"][None, :]
        pmu, psigma = c["pmu"][None, :], c["psigma"][None, :]
        x = mu + sigma * e
        ref_q += np.mean(-LOG_SQRT_2PI - np.log(sigma) - 0.5 * e * e)
        ref_p += np.mean(-LOG_SQRT_2PI - np.log(psigma)
                         - (x - pmu) ** 2 / (2.0 * psigma ** 2))
        np.testing.assert_allclose(np.asarray(samples[name]).reshape(B, P), x,
                                   rtol=1e-5, atol=1e-8)
    np.testing.assert_allclose(float(log_q), ref_q, rtol=1e-3, atol=1e-2)
    np.testing.assert_allclose(float(log_p), ref_p, rtol=1e-3, atol=1e-2)

    print("KERNEL_OK")
</pallas_src>

<mosaic_0001>
module attributes {stable_mosaic.version = 11 : i64} {
  func.func @_bayes_fused_kernel(%arg0: memref<16x128xf32, #tpu.memory_space<vmem>>, %arg1: memref<1x128xf32, #tpu.memory_space<vmem>>, %arg2: memref<1x128xf32, #tpu.memory_space<vmem>>, %arg3: memref<1x128xf32, #tpu.memory_space<vmem>>, %arg4: memref<1x128xf32, #tpu.memory_space<vmem>>, %arg5: memref<1x128xf32, #tpu.memory_space<vmem>>, %arg6: memref<1x128xf32, #tpu.memory_space<vmem>>, %arg7: memref<16x128xf32, #tpu.memory_space<vmem>>, %arg8: memref<16x128xf32, #tpu.memory_space<vmem>>, %arg9: memref<1x1xf32, #tpu.memory_space<smem>>, %arg10: memref<1x1xf32, #tpu.memory_space<smem>>) attributes {dimension_semantics = [], scalar_prefetch = 0 : i64, scratch_operands = 0 : i64, tpu.core_type = #tpu.core_type<tc>} {
    %c0 = arith.constant 0 : index
    %c0_0 = arith.constant 0 : index
    %0 = vector.load %arg0[%c0, %c0_0] : memref<16x128xf32, #tpu.memory_space<vmem>>, vector<16x128xf32>
    %c0_1 = arith.constant 0 : index
    %c0_2 = arith.constant 0 : index
    %1 = vector.load %arg7[%c0_1, %c0_2] : memref<16x128xf32, #tpu.memory_space<vmem>>, vector<16x128xf32>
    %c0_3 = arith.constant 0 : index
    %c0_4 = arith.constant 0 : index
    %2 = vector.load %arg1[%c0_3, %c0_4] : memref<1x128xf32, #tpu.memory_space<vmem>>, vector<1x128xf32>
    %c0_5 = arith.constant 0 : index
    %c0_6 = arith.constant 0 : index
    %3 = vector.load %arg2[%c0_5, %c0_6] : memref<1x128xf32, #tpu.memory_space<vmem>>, vector<1x128xf32>
    %4 = vector.broadcast %3 : vector<1x128xf32> to vector<16x128xf32>
    %5 = arith.mulf %4, %0 : vector<16x128xf32>
    %6 = vector.broadcast %2 : vector<1x128xf32> to vector<16x128xf32>
    %7 = arith.addf %6, %5 : vector<16x128xf32>
    %c0_7 = arith.constant 0 : index
    %c0_8 = arith.constant 0 : index
    %8 = vector.load %arg8[%c0_7, %c0_8] : memref<16x128xf32, #tpu.memory_space<vmem>>, vector<16x128xf32>
    tpu.vector_store %arg8[%c0_7, %c0_8], %7 {strides = array<i32>} : memref<16x128xf32, #tpu.memory_space<vmem>>, vector<16x128xf32>,
    %c0_9 = arith.constant 0 : index
    %c0_10 = arith.constant 0 : index
    %9 = vector.load %arg3[%c0_9, %c0_10] : memref<1x128xf32, #tpu.memory_space<vmem>>, vector<1x128xf32>
    %cst = arith.constant -0.918938517 : f32
    %10 = vector.broadcast %cst : f32 to vector<1x128xf32>
    %11 = arith.subf %10, %9 : vector<1x128xf32>
    %cst_11 = arith.constant 5.000000e-01 : f32
    %12 = vector.broadcast %cst_11 : f32 to vector<16x128xf32>
    %13 = arith.mulf %12, %0 : vector<16x128xf32>
    %14 = arith.mulf %13, %0 : vector<16x128xf32>
    %15 = vector.broadcast %11 : vector<1x128xf32> to vector<16x128xf32>
    %16 = arith.subf %15, %14 : vector<16x128xf32>
    %c0_12 = arith.constant 0 : index
    %c0_13 = arith.constant 0 : index
    %17 = vector.load %arg4[%c0_12, %c0_13] : memref<1x128xf32, #tpu.memory_space<vmem>>, vector<1x128xf32>
    %18 = vector.broadcast %17 : vector<1x128xf32> to vector<16x128xf32>
    %19 = arith.subf %7, %18 : vector<16x128xf32>
    %c0_14 = arith.constant 0 : index
    %c0_15 = arith.constant 0 : index
    %20 = vector.load %arg5[%c0_14, %c0_15] : memref<1x128xf32, #tpu.memory_space<vmem>>, vector<1x128xf32>
    %cst_16 = arith.constant -0.918938517 : f32
    %21 = vector.broadcast %cst_16 : f32 to vector<1x128xf32>
    %22 = arith.subf %21, %20 : vector<1x128xf32>
    %23 = arith.mulf %19, %19 : vector<16x128xf32>
    %c0_17 = arith.constant 0 : index
    %c0_18 = arith.constant 0 : index
    %24 = vector.load %arg6[%c0_17, %c0_18] : memref<1x128xf32, #tpu.memory_space<vmem>>, vector<1x128xf32>
    %25 = vector.broadcast %24 : vector<1x128xf32> to vector<16x128xf32>
    %26 = arith.mulf %23, %25 : vector<16x128xf32>
    %27 = vector.broadcast %22 : vector<1x128xf32> to vector<16x128xf32>
    %28 = arith.subf %27, %26 : vector<16x128xf32>
    %29 = arith.mulf %16, %1 : vector<16x128xf32>
    %30 = vector.shape_cast %29 : vector<16x128xf32> to vector<1x16x128xf32>
    %cst_19 = arith.constant dense<0.000000e+00> : vector<1xf32>
    %31 = vector.multi_reduction <add>, %30, %cst_19 [1, 2] : vector<1x16x128xf32> to vector<1xf32>
    %32 = vector.shape_cast %31 : vector<1xf32> to vector<1x1x1xf32>
    %33 = vector.extract %32[0, 0, 0] : f32 from vector<1x1x1xf32>
    %c0_20 = arith.constant 0 : index
    %c0_21 = arith.constant 0 : index
    %34 = memref.load %arg9[%c0_20, %c0_21] : memref<1x1xf32, #tpu.memory_space<smem>>
    memref.store %33, %arg9[%c0_20, %c0_21] : memref<1x1xf32, #tpu.memory_space<smem>>
    %35 = arith.mulf %28, %1 : vector<16x128xf32>
    %36 = vector.shape_cast %35 : vector<16x128xf32> to vector<1x16x128xf32>
    %cst_22 = arith.constant dense<0.000000e+00> : vector<1xf32>
    %37 = vector.multi_reduction <add>, %36, %cst_22 [1, 2] : vector<1x16x128xf32> to vector<1xf32>
    %38 = vector.shape_cast %37 : vector<1xf32> to vector<1x1x1xf32>
    %39 = vector.extract %38[0, 0, 0] : f32 from vector<1x1x1xf32>
    %c0_23 = arith.constant 0 : index
    %c0_24 = arith.constant 0 : index
    %40 = memref.load %arg10[%c0_23, %c0_24] : memref<1x1xf32, #tpu.memory_space<smem>>
    memref.store %39, %arg10[%c0_23, %c0_24] : memref<1x1xf32, #tpu.memory_space<smem>>
    return
  }
}

</mosaic_0001>

<bundles_post_ra>
// kernel: _reset_impl.1
= control target key start
LH: loop header
LB: loop body
LE: loop exit
PB: predicated region body
PF: predicated region fallthrough
CT: control target
= control target key end

     0   :  { %16 = vsyncpa [#allocation3], 0  ;;  %s282_s0 = inlined_call_operand.vmem [shape: f32[16,128], index: 0, kind: input, shape index: {}]   ;;  %s283_s1 = inlined_call_operand.vmem [shape: f32[1,128], index: 1, kind: input, shape index: {}]   ;;  %s284_s2 = inlined_call_operand.vmem [shape: f32[1,128], index: 2, kind: input, shape index: {}]   ;;  %s285_s3 = inlined_call_operand.vmem [shape: f32[1,128], index: 3, kind: input, shape index: {}]   ;;  %s286_s4 = inlined_call_operand.vmem [shape: f32[1,128], index: 4, kind: input, shape index: {}]   ;;  %s287_s5 = inlined_call_operand.vmem [shape: f32[1,128], index: 5, kind: input, shape index: {}]   ;;  %s288_s6 = inlined_call_operand.vmem [shape: f32[1,128], index: 6, kind: input, shape index: {}]   ;;  %s289_s7 = inlined_call_operand.vmem [shape: f32[16,128], index: 7, kind: input, shape index: {}]   ;;  %s290_s8 = inlined_call_operand.vmem [shape: f32[16,128], index: 8, kind: output, shape index: {0}]   ;;  %s291_s9 = inlined_call_operand.hbm [shape: f32[1,1], index: 9, kind: output, shape index: {1}]   ;;  %s292_s10 = inlined_call_operand.hbm [shape: f32[1,1], index: 10, kind: output, shape index: {2}]  }
   0x1   :  { %v34_v0 = vld [vmem:[%s282_s0] sm:$0xff]  ;;  %v35_v1 = vld [vmem:[%s282_s0 + $0x8] sm:$0xff] }
   0x2   :  { %v151_v2 = vld [vmem:[%s284_s2] ss:$0 sm:$0xff]  ;;  %v54_v3 = vmul.f32 0.5, %v34_v0  ;;  %v55_v5 = vmul.f32 0.5, %v35_v1  ;;  %v37_v19 = vld [vmem:[%s289_s7 + $0x8] sm:$0xff] }
   0x3   :  { %v52_v4 = vld [vmem:[%s285_s3] sm:$0x1]  ;;  %v44_v6 = vmul.f32 %v151_v2, %v35_v1  ;;  %v43_v9 = vmul.f32 %v151_v2, %v34_v0 }
   0x4   :  { %v53_v7 = vsub.f32 -0.9189385, %v52_v4  ;;  %v56_v8 = vmul.f32 %v54_v3, %v34_v0  ;;  %v152_v10 = vld [vmem:[%s283_s1] ss:$0 sm:$0xff]  ;;  %v57_v11 = vmul.f32 %v55_v5, %v35_v1 }
   0x5   :  { %v153_v12 = vld [vmem:[%s286_s4] ss:$0 sm:$0xff]  ;;  %v48_v15 = vadd.f32 %v152_v10, %v43_v9  ;;  %v49_v16 = vadd.f32 %v152_v10, %v44_v6 }
   0x6   :  { %v69_v13 = vld [vmem:[%s287_s5] sm:$0x1]  ;;  %v59_v14 = vperm.slane %v53_v7, 0 }
   0x7   :  { %v70_v17 = vsub.f32 -0.9189385, %v69_v13  ;;  %v36_v18 = vld [vmem:[%s289_s7] sm:$0xff] }
   0x8   :  { %17 = vsyncpa [#allocation5], 0  ;;  %v61_v20 = vsub.f32 %v59_v14, %v56_v8  ;;  %v62_v21 = vsub.f32 %v59_v14, %v57_v11  ;;  %51 = vst [vmem:[%s290_s8 + $0x8] sm:$0xff] %v49_v16  ;;  %v67_v22 = vsub.f32 %v48_v15, %v153_v12  ;;  %v68_v23 = vsub.f32 %v49_v16, %v153_v12  ;;  %v154_v24 = vld [vmem:[%s288_s6] ss:$0 sm:$0xff]  ;;  %s183_s12 = smov [#allocation2]  }
   0x9   :  { %v80_v25 = vperm.slane %v70_v17, 0  ;;  %50 = vst [vmem:[%s290_s8] sm:$0xff] %v48_v15  ;;  %s119_s8 = sshll.u32 %s291_s9, 4  ;;  %s128_s15 = sshll.u32 %s292_s10, 4  ;;  %s120_s8 = int_to_ptr.hbm [resolvable:$true] %s119_s8  ;;  %s129_s15 = int_to_ptr.hbm [resolvable:$true] %s128_s15 }
   0xa   :  { %v84_v26 = vmul.f32 %v61_v20, %v36_v18  ;;  %v85_v27 = vmul.f32 %v62_v21, %v37_v19  ;;  %v71_v28 = vmul.f32 %v67_v22, %v67_v22  ;;  %v72_v29 = vmul.f32 %v68_v23, %v68_v23  ;;  %s184_s17 = smov [#allocation4]  }
   0xc   :  { %v86_v30 = vadd.f32 %v85_v27, %v84_v26  ;;  %v77_v31 = vmul.f32 %v154_v24, %v71_v28  ;;  %v78_v32 = vmul.f32 %v154_v24, %v72_v29 }
   0xe   :  { %87 = vadd.xlane.f32.xlu0 %v86_v30  ;;  %v82_v33 = vsub.f32 %v80_v25, %v77_v31  ;;  %v83_v34 = vsub.f32 %v80_v25, %v78_v32 }
  0x10   :  { %v98_v35 = vmul.f32 %v82_v33, %v36_v18  ;;  %v99_v36 = vmul.f32 %v83_v34, %v37_v19 }
  0x12   :  { %v100_v37 = vadd.f32 %v99_v36, %v98_v35 }
  0x16   :  { %101 = vadd.xlane.f32.xlu0 %v100_v37 }
  0x81   :  { %v88_v38 = vpop.xlane.xlu0 %87 }
  0x82   :  { %v89_v39 = vrot.slane %v88_v38, 4 }
  0x84   :  { %v90_v40 = vadd.f32 %v89_v39, %v88_v38 }
  0x86   :  { %v91_v41 = vrot.slane %v90_v40, 2 }
  0x88   :  { %v92_v42 = vadd.f32 %v91_v41, %v90_v40 }
  0x89   :  { %v102_v43 = vpop.xlane.xlu0 %101 }
  0x8a   :  { %v103_v44 = vrot.slane %v102_v43, 4  ;;  %v93_v45 = vrot.slane %v92_v42, 1 }
  0x8c   :  { %v104_v46 = vadd.f32 %v103_v44, %v102_v43  ;;  %v94_v47 = vadd.f32 %v93_v45, %v92_v42 }
  0x8e   :  { %v105_v48 = vrot.slane %v104_v46, 2  ;;  %145 = vpush %v94_v47 }
  0x90   :  { %v106_v49 = vadd.f32 %v105_v48, %v104_v46 }
  0x92   :  { %v107_v50 = vrot.slane %v106_v49, 1 }
  0x94   :  { %v108_v51 = vadd.f32 %v107_v50, %v106_v49 }
  0x96   :  { %147 = vpush %v108_v51 }
  0xbf   :  { %s146_s11 = spop %145 }
  0xc0   :  { %97 = sst [smem:[#allocation2]] %s146_s11 }
  0xc1   :  { %122 = dma.smem_to_hbm %s183_s12, 16, %s120_s8, [#allocation3]  }
  0xc7   :  { %s148_s16 = spop %147 }
  0xc8   :  { %111 = sst [smem:[#allocation4]] %s148_s16 }
  0xc9   :  { %131 = dma.smem_to_hbm %s184_s17, 16, %s129_s15, [#allocation5]  }
  0xca   :  { %179 = dma.done.wait [#allocation3], 16  }
  0xcb   :  { %180 = vsyncadd [#allocation3], 4294967280 }
  0xcc   :  { %181 = dma.done.wait [#allocation5], 16  }
  0xcd   :  { %182 = vsyncadd [#allocation5], 4294967280 }
  0xce   :  { %142 = sfence }
  0xcf   :  { %143 = vsyncpa [#allocation3], 1 }
  0xd0   :  { %144 = vsyncpa [#allocation5], 1 }

</bundles_post_ra>
